<compile_context>
chip_gen: v5e
topology: v5e:2x2
jax: 0.10.0
libtpu: 0.0.40
codegen_flags: <defaults>
</compile_context>

<pallas_src>
import numpy as np
import jax
import jax.numpy as jnp
from jax.experimental import pallas as pl
from jax.experimental.pallas import tpu as pltpu

NUM_BRANCHES = 4
BN_EPS = 1e-5
LANE = 128

# For output parity class (py, px), which 3x3 ConvTranspose2d weight tap (ky, kx) multiplies
# each element of the 2x2 input neighbourhood [x(r,c), x(r,c+1), x(r+1,c), x(r+1,c+1)].
# None = that neighbour does not contribute to this class.
_CLASS_TAPS = (
    ((1, 1), None,   None,   None),     # (py=0, px=0)
    ((1, 2), (1, 0), None,   None),     # (py=0, px=1)
    ((2, 1), None,   (0, 1), None),     # (py=1, px=0)
    ((2, 2), (2, 0), (0, 2), (0, 0)),   # (py=1, px=1)
)


def _tensorcores_per_device() -> int:
    """2 on v7x (two TensorCores share one chip/device), 1 elsewhere. Never raises."""
    try:
        kind = jax.devices()[0].device_kind.lower()
    except Exception:
        return 1
    return 2 if "v7" in kind else 1


# ----------------------------- Pallas kernel ------------------------------ #
def decoder_part_kernel(p_ref, w1_ref, shift_ref, w2_ref, b2_ref, out_ref):
    # p_ref:     (K4, TN)   subpixel im2col columns (K4 = 4*Cin taps; TN pixels on lane axis)
    # w1_ref:    (C1, K4)   fused (class, branch, oc) conv-transpose weights, BN scale folded
    # shift_ref: (C1, 1)    folded conv-bias + BN shift
    # w2_ref:    (C2, C1)   block-diagonal 1x1 reduce conv (one w_r block per parity class)
    # b2_ref:    (C2, 1)    reduce bias (tiled per class)
    # out_ref:   (C2, TN)   lane-dense output (lane axis = pixel index)
    h = jnp.dot(w1_ref[...], p_ref[...], preferred_element_type=jnp.float32)
    h = h + shift_ref[...]
    # ELU(alpha=1); exp(min(h,0)) keeps the exp argument <= 0 (no overflow), lowers cleanly.
    h = jnp.where(h > 0, h, jnp.exp(jnp.minimum(h, 0.0)) - 1.0)
    out = jnp.dot(w2_ref[...], h, preferred_element_type=jnp.float32) + b2_ref[...]
    out_ref[...] = out.astype(out_ref.dtype)


# ------------------------------- wrapper ----------------------------------- #
def decoder_part_forward(x_nchw, params, output_padding=1, tile_n=4096):
    """Forward pass of DecoderPart. x_nchw: (B, Cin, H, W) float32."""
    assert output_padding in (0, 1), "only output_padding in {0, 1} is supported"
    w_t, b_t, gamma, beta, mean, var, w_r, b_r = (
        params["w_t"], params["b_t"], params["gamma"], params["beta"],
        params["mean"], params["var"], params["w_r"], params["b_r"],
    )
    B, Cin, H, W = x_nchw.shape
    OC = w_t.shape[2]
    OCr = w_r.shape[0]
    Hout = 2 * H - 1 + output_padding
    Wout = 2 * W - 1 + output_padding

    K4 = 4 * Cin                  # 2x2 input neighbourhood, tap-major / channel-minor
    C1 = 4 * NUM_BRANCHES * OC    # rows: (parity class, branch, out channel)
    C2 = 4 * OCr                  # rows: (parity class, reduce channel)
    N = B * H * W

    # --- glue: feature-major subpixel im2col, built by STACKING (no N-major transpose) ---
    x_f = jnp.transpose(x_nchw, (1, 0, 2, 3)).astype(jnp.float32)        # (Cin, B, H, W)
    xe = jnp.pad(x_f, ((0, 0), (0, 0), (0, 1), (0, 1)))                  # pad bottom/right
    taps = (xe[:, :, 0:H, 0:W], xe[:, :, 0:H, 1:W + 1],
            xe[:, :, 1:H + 1, 0:W], xe[:, :, 1:H + 1, 1:W + 1])
    patches_t = jnp.stack(taps, axis=0).reshape(K4, N)                   # (K4, N) lane = pixel

    # --- tile selection: large lane-aligned tiles; split only where 2 TCs exist (v7x) ---
    n_al = pl.cdiv(N, LANE) * LANE
    tn = pl.cdiv(min(tile_n, n_al), LANE) * LANE
    if _tensorcores_per_device() >= 2 and n_al // tn < 2 and n_al >= 2 * LANE:
        tn = pl.cdiv(pl.cdiv(n_al, 2), LANE) * LANE
    N_pad = pl.cdiv(N, tn) * tn
    if N_pad != N:
        patches_t = jnp.pad(patches_t, ((0, 0), (0, N_pad - N)))

    # --- glue: fold parameters (BN scale into weights; conv bias + BN shift into one add) ---
    scale = gamma / jnp.sqrt(var + BN_EPS)                               # (NB, OC)
    shift = (b_t - mean) * scale + beta                                  # (NB, OC)

    blocks = []
    for cls in range(4):
        tap_mats = []
        for tap in range(4):
            kk = _CLASS_TAPS[cls][tap]
            if kk is None:
                tap_mats.append(jnp.zeros((NUM_BRANCHES * OC, Cin), jnp.float32))
            else:
                ky, kx = kk
                m = jnp.transpose(w_t[:, :, :, ky, kx], (0, 2, 1))       # (NB, OC, Cin)
                tap_mats.append(m.reshape(NUM_BRANCHES * OC, Cin))
        blocks.append(jnp.concatenate(tap_mats, axis=1))                 # (NB*OC, K4)
    w1 = jnp.concatenate(blocks, axis=0).astype(jnp.float32)             # (C1, K4)
    w1 = w1 * jnp.tile(scale.reshape(-1), 4)[:, None]                    # fold BN scale
    shift_col = jnp.tile(shift.reshape(-1), 4)[:, None].astype(jnp.float32)   # (C1, 1)

    # block-diagonal 1x1 reduce; fine at small OC/OCr (see header note for large channels)
    w2 = jnp.kron(jnp.eye(4, dtype=jnp.float32), w_r.astype(jnp.float32))     # (C2, C1)
    b2 = jnp.tile(b_r, 4)[:, None].astype(jnp.float32)                        # (C2, 1)

    # --- scheduler hints: cost estimate + explicit VMEM budget ---
    weight_elems = C1 * K4 + C2 * C1 + C1 + C2
    cost = pl.CostEstimate(
        flops=2 * N_pad * (C1 * K4 + C2 * C1),
        transcendentals=N_pad * C1,
        bytes_accessed=4 * ((K4 + C2) * N_pad + weight_elems),
    )
    # double-buffered streamed tiles + resident intermediate + (default double-buffered) weights
    vmem_need = (2 * (K4 + C2) * tn + C1 * tn) * 4 + 2 * weight_elems * 4 + (1 << 20)
    cp_kwargs = dict(dimension_semantics=("parallel",))
    if vmem_need > (16 << 20):                      # only raise above the small default limits
        cp_kwargs["vmem_limit_bytes"] = int(min(vmem_need, 48 << 20))

    # --- Pallas call: 1-D grid over lane-dense pixel-quartet columns ---
    out_t = pl.pallas_call(
        decoder_part_kernel,
        out_shape=jax.ShapeDtypeStruct((C2, N_pad), jnp.float32),
        grid_spec=pltpu.PrefetchScalarGridSpec(
            num_scalar_prefetch=0,
            grid=(N_pad // tn,),
            in_specs=[
                pl.BlockSpec((K4, tn), lambda i: (0, i)),
                pl.BlockSpec((C1, K4), lambda i: (0, 0)),
                pl.BlockSpec((C1, 1), lambda i: (0, 0)),
                pl.BlockSpec((C2, C1), lambda i: (0, 0)),
                pl.BlockSpec((C2, 1), lambda i: (0, 0)),
            ],
            out_specs=pl.BlockSpec((C2, tn), lambda i: (0, i)),
        ),
        compiler_params=pltpu.CompilerParams(**cp_kwargs),
        cost_estimate=cost,
    )(patches_t, w1, shift_col, w2, b2)

    # --- glue: subpixel reassembly -> NCHW (crop handles output_padding = 0 or 1) ---
    o = out_t[:, :N].reshape(2, 2, OCr, B, H, W)                         # (py, px, ocr, b, r, c)
    o = jnp.transpose(o, (3, 2, 4, 0, 5, 1)).reshape(B, OCr, 2 * H, 2 * W)
    return o[:, :, :Hout, :Wout]


# --------------------- independent NumPy reference ------------------------- #
def reference_forward(x, params, output_padding):
    x = np.asarray(x, np.float64)
    B, Cin, H, W = x.shape
    w_t = np.asarray(params["w_t"], np.float64)
    b_t = np.asarray(params["b_t"], np.float64)
    gamma = np.asarray(params["gamma"], np.float64)
    beta = np.asarray(params["beta"], np.float64)
    mean = np.asarray(params["mean"], np.float64)
    var = np.asarray(params["var"], np.float64)
    w_r = np.asarray(params["w_r"], np.float64)
    b_r = np.asarray(params["b_r"], np.float64)
    OC = w_t.shape[2]
    Hout = 2 * H - 1 + output_padding
    Wout = 2 * W - 1 + output_padding

    outs = []
    for i in range(NUM_BRANCHES):
        # direct scatter formulation of ConvTranspose2d(k=3, s=2, p=1, op=output_padding)
        ext = np.zeros((B, OC, 2 * H + 1, 2 * W + 1), np.float64)
        for ky in range(3):
            for kx in range(3):
                contrib = np.einsum("bchw,co->bohw", x, w_t[i, :, :, ky, kx])
                ext[:, :, ky:ky + 2 * H:2, kx:kx + 2 * W:2] += contrib
        conv = ext[:, :, 1:1 + Hout, 1:1 + Wout] + b_t[i][None, :, None, None]
        bn = (conv - mean[i][None, :, None, None]) / np.sqrt(var[i][None, :, None, None] + BN_EPS)
        bn = bn * gamma[i][None, :, None, None] + beta[i][None, :, None, None]
        outs.append(np.where(bn > 0, bn, np.exp(bn) - 1.0))
    cat = np.concatenate(outs, axis=1)                                   # (B, 4*OC, Hout, Wout)
    red = np.einsum("bchw,oc->bohw", cat, w_r) + b_r[None, :, None, None]
    return red


# --------------------------------- main ------------------------------------ #
if __name__ == "__main__":
    B, Cin, H, W = 2, 4, 16, 16
    OC = 4            # outChannel
    OCr = OC          # reduce conv output channels
    OUTPUT_PADDING = 1

    key = jax.random.PRNGKey(0)
    ks = jax.random.split(key, 9)
    params = {
        "w_t":   jax.random.normal(ks[0], (NUM_BRANCHES, Cin, OC, 3, 3), jnp.float32) * 0.2,
        "b_t":   jax.random.normal(ks[1], (NUM_BRANCHES, OC), jnp.float32) * 0.1,
        "gamma": jax.random.uniform(ks[2], (NUM_BRANCHES, OC), jnp.float32, 0.5, 1.5),
        "beta":  jax.random.normal(ks[3], (NUM_BRANCHES, OC), jnp.float32) * 0.1,
        "mean":  jax.random.normal(ks[4], (NUM_BRANCHES, OC), jnp.float32) * 0.1,
        "var":   jax.random.uniform(ks[5], (NUM_BRANCHES, OC), jnp.float32, 0.5, 1.5),
        "w_r":   jax.random.normal(ks[6], (OCr, NUM_BRANCHES * OC), jnp.float32) * 0.2,
        "b_r":   jax.random.normal(ks[7], (OCr,), jnp.float32) * 0.1,
    }
    x = jax.random.normal(ks[8], (B, Cin, H, W), jnp.float32)

    out = decoder_part_forward(x, params, output_padding=OUTPUT_PADDING)
    out = jax.block_until_ready(out)

    ref = reference_forward(x, params, OUTPUT_PADDING)
    assert out.shape == ref.shape, (out.shape, ref.shape)
    np.testing.assert_allclose(np.asarray(out, np.float64), ref, rtol=1e-3, atol=1e-3)

    print("KERNEL_OK")
</pallas_src>

<mosaic_0001>
module attributes {stable_mosaic.version = 11 : i64} {
  func.func @decoder_part_kernel(%arg0: i32, %arg1: memref<16x512xf32, #tpu.memory_space<vmem>>, %arg2: memref<64x16xf32, #tpu.memory_space<vmem>>, %arg3: memref<64x1xf32, #tpu.memory_space<vmem>>, %arg4: memref<16x64xf32, #tpu.memory_space<vmem>>, %arg5: memref<16x1xf32, #tpu.memory_space<vmem>>, %arg6: memref<16x512xf32, #tpu.memory_space<vmem>>) attributes {dimension_semantics = [#tpu.dimension_semantics<parallel>], iteration_bounds = array<i64: 1>, scalar_prefetch = 0 : i64, scratch_operands = 0 : i64, tpu.core_type = #tpu.core_type<tc>, window_params = [{transform_indices = @transform_0, window_bounds = array<i64: 16, 512>}, {pipeline_mode = #tpu.pipeline_mode<synchronous>, transform_indices = @transform_1, window_bounds = array<i64: 64, 16>}, {pipeline_mode = #tpu.pipeline_mode<synchronous>, transform_indices = @transform_2, window_bounds = array<i64: 64, 1>}, {pipeline_mode = #tpu.pipeline_mode<synchronous>, transform_indices = @transform_3, window_bounds = array<i64: 16, 64>}, {pipeline_mode = #tpu.pipeline_mode<synchronous>, transform_indices = @transform_4, window_bounds = array<i64: 16, 1>}, {transform_indices = @transform_5, window_bounds = array<i64: 16, 512>}]} {
    %c0 = arith.constant 0 : index
    %c0_0 = arith.constant 0 : index
    %0 = vector.load %arg2[%c0, %c0_0] : memref<64x16xf32, #tpu.memory_space<vmem>>, vector<64x16xf32>
    %c0_1 = arith.constant 0 : index
    %c0_2 = arith.constant 0 : index
    %1 = vector.load %arg1[%c0_1, %c0_2] : memref<16x512xf32, #tpu.memory_space<vmem>>, vector<16x512xf32>
    %cst = arith.constant dense<0.000000e+00> : vector<64x512xf32>
    %2 = tpu.matmul %0, %1, %cst {dimension_numbers = #tpu.dot_dimension_numbers<[1], [0], [0], [1], [0, 0, 1, 1], [], []>} : vector<64x16xf32>, vector<16x512xf32>, vector<64x512xf32> -> vector<64x512xf32>
    %c0_3 = arith.constant 0 : index
    %c0_4 = arith.constant 0 : index
    %3 = vector.load %arg3[%c0_3, %c0_4] : memref<64x1xf32, #tpu.memory_space<vmem>>, vector<64x1xf32>
    %4 = vector.broadcast %3 : vector<64x1xf32> to vector<64x512xf32>
    %5 = arith.addf %2, %4 : vector<64x512xf32>
    %cst_5 = arith.constant 0.000000e+00 : f32
    %6 = vector.broadcast %cst_5 : f32 to vector<64x512xf32>
    %7 = arith.cmpf ogt, %5, %6 : vector<64x512xf32>
    %cst_6 = arith.constant 0.000000e+00 : f32
    %8 = vector.broadcast %cst_6 : f32 to vector<64x512xf32>
    %9 = arith.minimumf %5, %8 : vector<64x512xf32>
    %10 = math.exp %9 : vector<64x512xf32>
    %cst_7 = arith.constant 1.000000e+00 : f32
    %11 = vector.broadcast %cst_7 : f32 to vector<64x512xf32>
    %12 = arith.subf %10, %11 : vector<64x512xf32>
    %13 = arith.select %7, %5, %12 : vector<64x512xi1>, vector<64x512xf32>
    %c0_8 = arith.constant 0 : index
    %c0_9 = arith.constant 0 : index
    %14 = vector.load %arg4[%c0_8, %c0_9] : memref<16x64xf32, #tpu.memory_space<vmem>>, vector<16x64xf32>
    %cst_10 = arith.constant dense<0.000000e+00> : vector<16x512xf32>
    %15 = tpu.matmul %14, %13, %cst_10 {dimension_numbers = #tpu.dot_dimension_numbers<[1], [0], [0], [1], [0, 0, 1, 1], [], []>} : vector<16x64xf32>, vector<64x512xf32>, vector<16x512xf32> -> vector<16x512xf32>
    %c0_11 = arith.constant 0 : index
    %c0_12 = arith.constant 0 : index
    %16 = vector.load %arg5[%c0_11, %c0_12] : memref<16x1xf32, #tpu.memory_space<vmem>>, vector<16x1xf32>
    %17 = vector.broadcast %16 : vector<16x1xf32> to vector<16x512xf32>
    %18 = arith.addf %15, %17 : vector<16x512xf32>
    %c0_13 = arith.constant 0 : index
    %c0_14 = arith.constant 0 : index
    %19 = vector.load %arg6[%c0_13, %c0_14] : memref<16x512xf32, #tpu.memory_space<vmem>>, vector<16x512xf32>
    tpu.vector_store %arg6[%c0_13, %c0_14], %18 {strides = array<i32>} : memref<16x512xf32, #tpu.memory_space<vmem>>, vector<16x512xf32>,
    return
  }
  func.func @transform_0(%arg0: i32) -> (i32, i32) {
    %c0_i32 = arith.constant 0 : i32
    %c0_i32_0 = arith.constant 0 : i32
    return %c0_i32, %arg0 : i32, i32
  }
  func.func @transform_1(%arg0: i32) -> (i32, i32) {
    %c0_i32 = arith.constant 0 : i32
    %c0_i32_0 = arith.constant 0 : i32
    %c0_i32_1 = arith.constant 0 : i32
    return %c0_i32, %c0_i32_0 : i32, i32
  }
  func.func @transform_2(%arg0: i32) -> (i32, i32) {
    %c0_i32 = arith.constant 0 : i32
    %c0_i32_0 = arith.constant 0 : i32
    %c0_i32_1 = arith.constant 0 : i32
    return %c0_i32, %c0_i32_0 : i32, i32
  }
  func.func @transform_3(%arg0: i32) -> (i32, i32) {
    %c0_i32 = arith.constant 0 : i32
    %c0_i32_0 = arith.constant 0 : i32
    %c0_i32_1 = arith.constant 0 : i32
    return %c0_i32, %c0_i32_0 : i32, i32
  }
  func.func @transform_4(%arg0: i32) -> (i32, i32) {
    %c0_i32 = arith.constant 0 : i32
    %c0_i32_0 = arith.constant 0 : i32
    %c0_i32_1 = arith.constant 0 : i32
    return %c0_i32, %c0_i32_0 : i32, i32
  }
  func.func @transform_5(%arg0: i32) -> (i32, i32) {
    %c0_i32 = arith.constant 0 : i32
    %c0_i32_0 = arith.constant 0 : i32
    return %c0_i32, %arg0 : i32, i32
  }
}

</mosaic_0001>

<bundles_post_ra>
// kernel: tpu_custom_call.1
= control target key start
LH: loop header
LB: loop body
LE: loop exit
PB: predicated region body
PF: predicated region fallthrough
CT: control target
= control target key end

     0   :  { %v774_v3 = vmov 0   ;;  %vm85_vm0 = vcmask 130048   ;;  %s1221_s0 = inlined_call_operand.vmem [shape: f32[16,512], index: 0, kind: input, shape index: {}]   ;;  %s1222_s1 = inlined_call_operand.vmem [shape: f32[64,16], index: 1, kind: input, shape index: {}]   ;;  %s1223_s2 = inlined_call_operand.vmem [shape: f32[64,1], index: 2, kind: input, shape index: {}]   ;;  %s1224_s3 = inlined_call_operand.vmem [shape: f32[16,64], index: 3, kind: input, shape index: {}]   ;;  %s1225_s4 = inlined_call_operand.vmem [shape: f32[16,1], index: 4, kind: input, shape index: {}]   ;;  %s1226_s5 = inlined_call_operand.hbm [shape: f32[16,512], index: 5, kind: output, shape index: {}]  }
   0x1   :  { %v33_v0 = vld [vmem:[%s1221_s0 + $0x20] sm:$0xff]  ;;  %v34_v1 = vld [vmem:[%s1221_s0 + $0x28] sm:$0xff]  ;;  %v35_v2 = vld [vmem:[%s1221_s0 + $0x30] sm:$0xff]  ;;  %682 = vset.pattern.permute.xlu1 %v774_v3 }
   0x2   :  { %124 = vmatpush.msra.mxu0 %v33_v0  ;;  %v36_v4 = vld [vmem:[%s1221_s0 + $0x38] sm:$0xff]  ;;  %v42_v5 = vld [vmem:[%s1223_s2 + $0x28] sm:$0xff]  ;;  %v29_v6 = vld [vmem:[%s1221_s0] sm:$0xff]  ;;  %165 = vmatpush.msra.mxu1 %v34_v1 }
   0x3   :  { %206 = vmatpush.msra.mxu2 %v35_v2  ;;  %v30_v7 = vld [vmem:[%s1221_s0 + $0x8] sm:$0xff]  ;;  %v31_v8 = vld [vmem:[%s1221_s0 + $0x10] sm:$0xff]  ;;  %v32_v9 = vld [vmem:[%s1221_s0 + $0x18] sm:$0xff]  ;;  %247 = vmatpush.msra.mxu3 %v36_v4 }
   0x4   :  { %72 = vperm.xlu1 %682, %v42_v5   ;;  %v21_v10 = vld [vmem:[%s1222_s1] sm:$0xff]  ;;  %125 = vmatpush.msra.mxu0 %v29_v6  ;;  %v44_v11 = vld [vmem:[%s1223_s2 + $0x38] sm:$0xff] }
   0x5   :  { %166 = vmatpush.msra.mxu1 %v30_v7  ;;  %207 = vmatpush.msra.mxu2 %v31_v8 }
   0x6   :  { %248 = vmatpush.msra.mxu3 %v32_v9  ;;  %605 = vmatmul.msk.f32.vlgmr.msra.gmra.mxu0 %vm85_vm0, %v21_v10 }
   0x7   :  { %613 = vmatmul.msk.f32.vlgmr.msra.gmra.mxu1 %vm85_vm0, %v21_v10 }
   0x8   :  { %10 = vsyncpa [#allocation3], 0  ;;  %621 = vmatmul.msk.f32.vlgmr.msra.gmra.mxu2 %vm85_vm0, %v21_v10  ;;  %629 = vmatmul.msk.f32.vlgmr.msra.gmra.mxu3 %vm85_vm0, %v21_v10  ;;  %v41_v12 = vld [vmem:[%s1223_s2 + $0x20] sm:$0xff]  ;;  %v22_v13 = vld [vmem:[%s1222_s1 + $0x8] sm:$0xff]  ;;  %s593_s22 = sshll.u32 %s1226_s5, 4  ;;  %s776_s23 = smov 512   ;;  %s594_s22 = int_to_ptr.hbm [resolvable:$true] %s593_s22 }
   0x9   :  { %681 = vset.pattern.permute.xlu0 %v774_v3  ;;  %683 = vset.pattern.permute.xlu2 %v774_v3  ;;  %v43_v14 = vld [vmem:[%s1223_s2 + $0x30] sm:$0xff]  ;;  %v40_v15 = vld [vmem:[%s1223_s2 + $0x18] sm:$0xff]  ;;  %v37_v16 = vld [vmem:[%s1223_s2] sm:$0xff]  ;;  %s777_s24 = smov 32  }
   0xa   :  { %82 = vperm.xlu0 %681, %v44_v11   ;;  %62 = vperm.xlu2 %683, %v40_v15   ;;  %v23_v17 = vld [vmem:[%s1222_s1 + $0x10] sm:$0xff]  ;;  %v38_v18 = vld [vmem:[%s1223_s2 + $0x8] sm:$0xff]  ;;  %v24_v20 = vld [vmem:[%s1222_s1 + $0x18] sm:$0xff] }
   0xb   :  { %v39_v19 = vld [vmem:[%s1223_s2 + $0x10] sm:$0xff]  ;;  %v469_v21 = vld [vmem:[%s1225_s4 + $0x8] sm:$0xff]  ;;  %v25_v22 = vld [vmem:[%s1222_s1 + $0x20] sm:$0xff] }
   0xc   :  { %67 = vperm.xlu1 %682, %v41_v12   ;;  %v26_v23 = vld [vmem:[%s1222_s1 + $0x28] sm:$0xff]  ;;  %v27_v24 = vld [vmem:[%s1222_s1 + $0x30] sm:$0xff]  ;;  %v28_v25 = vld [vmem:[%s1222_s1 + $0x38] sm:$0xff] }
   0xd   :  { %v468_v26 = vld [vmem:[%s1225_s4] sm:$0xff] }
   0xe   :  { %606 = vmatmul.msk.f32.gmra.mxu0 %vm85_vm0, %v22_v13 }
   0xf   :  { %614 = vmatmul.msk.f32.gmra.mxu1 %vm85_vm0, %v22_v13 }
  0x10   :  { %622 = vmatmul.msk.f32.gmra.mxu2 %vm85_vm0, %v22_v13  ;;  %630 = vmatmul.msk.f32.gmra.mxu3 %vm85_vm0, %v22_v13 }
  0x12   :  { %77 = vperm.xlu0 %681, %v43_v14   ;;  %57 = vperm.xlu2 %683, %v39_v19  }
  0x14   :  { %47 = vperm.xlu1 %682, %v37_v16  }
  0x16   :  { %607 = vmatmul.msk.f32.gmra.mxu0 %vm85_vm0, %v23_v17 }
  0x17   :  { %615 = vmatmul.msk.f32.gmra.mxu1 %vm85_vm0, %v23_v17 }
  0x18   :  { %623 = vmatmul.msk.f32.gmra.mxu2 %vm85_vm0, %v23_v17  ;;  %631 = vmatmul.msk.f32.gmra.mxu3 %vm85_vm0, %v23_v17 }
  0x1a   :  { %52 = vperm.xlu0 %681, %v38_v18   ;;  %472 = vperm.xlu2 %683, %v468_v26  }
  0x1e   :  { %608 = vmatmul.msk.f32.gmra.mxu0 %vm85_vm0, %v24_v20 }
  0x1f   :  { %616 = vmatmul.msk.f32.gmra.mxu1 %vm85_vm0, %v24_v20 }
  0x20   :  { %624 = vmatmul.msk.f32.gmra.mxu2 %vm85_vm0, %v24_v20  ;;  %632 = vmatmul.msk.f32.gmra.mxu3 %vm85_vm0, %v24_v20 }
  0x22   :  { %477 = vperm.xlu0 %681, %v469_v21  }
  0x26   :  { %609 = vmatmul.msk.f32.gmra.mxu0 %vm85_vm0, %v25_v22 }
  0x27   :  { %617 = vmatmul.msk.f32.gmra.mxu1 %vm85_vm0, %v25_v22 }
  0x28   :  { %625 = vmatmul.msk.f32.gmra.mxu2 %vm85_vm0, %v25_v22  ;;  %633 = vmatmul.msk.f32.gmra.mxu3 %vm85_vm0, %v25_v22 }
  0x2e   :  { %610 = vmatmul.msk.f32.gmra.mxu0 %vm85_vm0, %v26_v23 }
  0x2f   :  { %618 = vmatmul.msk.f32.gmra.mxu1 %vm85_vm0, %v26_v23 }
  0x30   :  { %626 = vmatmul.msk.f32.gmra.mxu2 %vm85_vm0, %v26_v23  ;;  %634 = vmatmul.msk.f32.gmra.mxu3 %vm85_vm0, %v26_v23 }
  0x36   :  { %611 = vmatmul.msk.f32.gmra.mxu0 %vm85_vm0, %v27_v24 }
  0x37   :  { %619 = vmatmul.msk.f32.gmra.mxu1 %vm85_vm0, %v27_v24 }
  0x38   :  { %627 = vmatmul.msk.f32.gmra.mxu2 %vm85_vm0, %v27_v24  ;;  %635 = vmatmul.msk.f32.gmra.mxu3 %vm85_vm0, %v27_v24 }
  0x3e   :  { %612 = vmatmul.msk.f32.gmra.mxu0 %vm85_vm0, %v28_v25 }
  0x3f   :  { %620 = vmatmul.msk.f32.gmra.mxu1 %vm85_vm0, %v28_v25 }
  0x40   :  { %628 = vmatmul.msk.f32.gmra.mxu2 %vm85_vm0, %v28_v25  ;;  %636 = vmatmul.msk.f32.gmra.mxu3 %vm85_vm0, %v28_v25 }
  0x64   :  { %v63_v43 = vpop.permute.xlu2 %62 }
  0x6c   :  { %v58_v59 = vpop.permute.xlu2 %57 }
  0x76   :  { %v918_v29 = vpop.permute.xlu1 %72 }
  0x7c   :  { %v920_v34 = vpop.permute.xlu0 %82 }
  0x7e   :  { %v922_v37 = vpop.permute.xlu1 %67 }
  0x83   :  { %v127_v27 = vpop.f32.mrf.mxu0 }
  0x84   :  { %v168_v28 = vpop.f32.mrf.mxu1  ;;  %v924_v40 = vpop.permute.xlu0 %77 }
  0x86   :  { %v48_v46 = vpop.permute.xlu1 %47 }
  0x87   :  { %v926_v47 = vadd.f32 %v127_v27, %v48_v46  ;;  %v928_v48 = vadd.f32 %v168_v28, %v48_v46 }
  0x89   :  { %v306_v57 = vmin.f32 %v926_v47, 0.0  ;;  %v307_v60 = vmin.f32 %v928_v48, 0.0  ;;  %vm274_vm0 = vcmp.gt.f32.partialorder %v926_v47, 0.0 }
  0x8b   :  { %v209_v30 = vpop.f32.mrf.mxu2  ;;  %v250_v31 = vpop.f32.mrf.mxu3  ;;  %v338_v3 = vmul.f32 1.442695, %v306_v57  ;;  %v340_v6 = vmul.f32 1.442695, %v307_v60 }
  0x8c   :  { %v130_v32 = vpop.f32.mrf.mxu0  ;;  %v171_v33 = vpop.f32.mrf.mxu1  ;;  %v930_v50 = vadd.f32 %v209_v30, %v48_v46  ;;  %v932_v53 = vadd.f32 %v250_v31, %v48_v46 }
  0x8d   :  { %v53_v49 = vpop.permute.xlu0 %52  ;;  %684 = vpow2.f32 %v338_v3 }
  0x8e   :  { %1235 = vst [vmem:[#allocation5_spill] sm:$0xff] %v930_v50  ;;  %v934_v55 = vadd.f32 %v130_v32, %v53_v49  ;;  %v937_v58 = vadd.f32 %v171_v33, %v53_v49  ;;  %v308_v61 = vmin.f32 %v930_v50, 0.0  ;;  %v309_v63 = vmin.f32 %v932_v53, 0.0 }
  0x8f   :  { %1236 = vst [vmem:[#allocation6_spill] sm:$0xff] %v932_v53  ;;  %686 = vpow2.f32 %v340_v6 }
  0x90   :  { %v310_v1 = vmin.f32 %v934_v55, 0.0  ;;  %v311_v4 = vmin.f32 %v937_v58, 0.0  ;;  %v342_v7 = vmul.f32 1.442695, %v308_v61  ;;  %v344_v12 = vmul.f32 1.442695, %v309_v63 }
  0x91   :  { %vm278_vm10 = vcmp.gt.f32.partialorder %v934_v55, 0.0  ;;  %vm279_vm11 = vcmp.gt.f32.partialorder %v937_v58, 0.0 }
  0x92   :  { %v346_v16 = vmul.f32 1.442695, %v310_v1  ;;  %v348_v20 = vmul.f32 1.442695, %v311_v4  ;;  %688 = vpow2.f32 %v342_v7 }
  0x93   :  { %v212_v35 = vpop.f32.mrf.mxu2  ;;  %v253_v36 = vpop.f32.mrf.mxu3  ;;  %690 = vpow2.f32 %v344_v12 }
  0x94   :  { %v133_v38 = vpop.f32.mrf.mxu0  ;;  %v174_v39 = vpop.f32.mrf.mxu1  ;;  %v941_v62 = vadd.f32 %v212_v35, %v53_v49  ;;  %v944_v0 = vadd.f32 %v253_v36, %v53_v49  ;;  %692 = vpow2.f32 %v346_v16 }
  0x95   :  { %v947_v2 = vadd.f32 %v133_v38, %v58_v59  ;;  %v950_v5 = vadd.f32 %v174_v39, %v58_v59  ;;  %694 = vpow2.f32 %v348_v20  ;;  %v979_v36 = vpop.eup %684 }
  0x96   :  { %1237 = vst [vmem:[#allocation7_spill] sm:$0xff] %v941_v62  ;;  %v312_v8 = vmin.f32 %v941_v62, 0.0  ;;  %v313_v13 = vmin.f32 %v944_v0, 0.0 }
  0x97   :  { %1238 = vst [vmem:[#allocation8_spill] sm:$0xff] %v944_v0  ;;  %v314_v17 = vmin.f32 %v947_v2, 0.0  ;;  %v315_v21 = vmin.f32 %v950_v5, 0.0  ;;  %vm282_vm5 = vcmp.gt.f32.partialorder %v947_v2, 0.0  ;;  %vm283_vm7 = vcmp.gt.f32.partialorder %v950_v5, 0.0 }
  0x98   :  { %v350_v23 = vmul.f32 1.442695, %v312_v8  ;;  %v352_v26 = vmul.f32 1.442695, %v313_v13 }
  0x99   :  { %v354_v30 = vmul.f32 1.442695, %v314_v17  ;;  %v356_v33 = vmul.f32 1.442695, %v315_v21 }
  0x9a   :  { %696 = vpow2.f32 %v350_v23 }
  0x9b   :  { %v215_v41 = vpop.f32.mrf.mxu2  ;;  %v256_v42 = vpop.f32.mrf.mxu3  ;;  %698 = vpow2.f32 %v352_v26 }
  0x9c   :  { %v136_v44 = vpop.f32.mrf.mxu0  ;;  %v177_v45 = vpop.f32.mrf.mxu1  ;;  %v953_v9 = vadd.f32 %v215_v41, %v58_v59  ;;  %v960_v14 = vadd.f32 %v256_v42, %v58_v59  ;;  %700 = vpow2.f32 %v354_v30 }
  0x9d   :  { %v963_v18 = vadd.f32 %v136_v44, %v63_v43  ;;  %v966_v22 = vadd.f32 %v177_v45, %v63_v43  ;;  %v985_v44 = vpop.eup %686  ;;  %702 = vpow2.f32 %v356_v33 }
  0x9e   :  { %v316_v24 = vmin.f32 %v953_v9, 0.0  ;;  %v317_v27 = vmin.f32 %v960_v14, 0.0 }
  0x9f   :  { %v318_v31 = vmin.f32 %v963_v18, 0.0  ;;  %v319_v35 = vmin.f32 %v966_v22, 0.0  ;;  %vm286_vm1 = vcmp.gt.f32.partialorder %v963_v18, 0.0  ;;  %vm287_vm3 = vcmp.gt.f32.partialorder %v966_v22, 0.0 }
  0xa0   :  { %v358_v38 = vmul.f32 1.442695, %v316_v24  ;;  %v360_v45 = vmul.f32 1.442695, %v317_v27 }
  0xa1   :  { %v364_v61 = vmul.f32 1.442695, %v319_v35 }
  0xa2   :  { %704 = vpow2.f32 %v358_v38 }
  0xa3   :  { %v218_v51 = vpop.f32.mrf.mxu2  ;;  %v259_v52 = vpop.f32.mrf.mxu3  ;;  %706 = vpow2.f32 %v360_v45 }
  0xa4   :  { %v139_v54 = vpop.f32.mrf.mxu0  ;;  %v180_v56 = vpop.f32.mrf.mxu1  ;;  %v969_v25 = vadd.f32 %v218_v51, %v63_v43  ;;  %v972_v28 = vadd.f32 %v259_v52, %v63_v43 }
  0xa5   :  { %v976_v32 = vadd.f32 %v139_v54, %v922_v37  ;;  %v983_v41 = vadd.f32 %v180_v56, %v922_v37  ;;  %v991_v52 = vpop.eup %688  ;;  %v362_v54 = vmul.f32 1.442695, %v318_v31 }
  0xa6   :  { %v320_v39 = vmin.f32 %v969_v25, 0.0  ;;  %v321_v46 = vmin.f32 %v972_v28, 0.0  ;;  %v997_v60 = vpop.eup %690 }
  0xa7   :  { %v322_v57 = vmin.f32 %v976_v32, 0.0  ;;  %1239 = vst [vmem:[#allocation9_spill] sm:$0xff] %v997_v60  ;;  %v1002_v1 = vpop.eup %692  ;;  %v323_v4 = vmin.f32 %v983_v41, 0.0  ;;  %708 = vpow2.f32 %v362_v54  ;;  %vm290_vm2 = vcmp.gt.f32.partialorder %v976_v32, 0.0 }
  0xa8   :  { %v366_v3 = vmul.f32 1.442695, %v320_v39  ;;  %v1008_v7 = vpop.eup %694  ;;  %v368_v8 = vmul.f32 1.442695, %v321_v46  ;;  %710 = vpow2.f32 %v364_v61  ;;  %vm291_vm14 = vcmp.gt.f32.partialorder %v983_v41, 0.0 }
  0xa9   :  { %v1011_v13 = vpop.eup %696  ;;  %v372_v23 = vmul.f32 1.442695, %v323_v4  ;;  %v1090_v60 = vadd.f32 -1.0, %v1008_v7 }
  0xaa   :  { %v1014_v17 = vpop.eup %698  ;;  %712 = vpow2.f32 %v366_v3 }
  0xab   :  { %v955_v10 = vpop.f32.mrf.mxu2  ;;  %v957_v11 = vpop.f32.mrf.mxu3  ;;  %714 = vpow2.f32 %v368_v8 }
  0xac   :  { %v142_v15 = vpop.f32.mrf.mxu0  ;;  %v183_v19 = vpop.f32.mrf.mxu1 }
  0xad   :  { %v989_v49 = vadd.f32 %v142_v15, %v918_v29  ;;  %v995_v56 = vadd.f32 %v183_v19, %v918_v29  ;;  %v370_v15 = vmul.f32 1.442695, %v322_v57  ;;  %v1020_v21 = vpop.eup %700 }
  0xae   :  { %v1026_v31 = vpop.eup %702 }
  0xaf   :  { %v326_v12 = vmin.f32 %v989_v49, 0.0  ;;  %v327_v16 = vmin.f32 %v995_v56, 0.0  ;;  %v1031_v39 = vpop.eup %704  ;;  %716 = vpow2.f32 %v370_v15  ;;  %vm294_vm9 = vcmp.gt.f32.partialorder %v989_v49, 0.0 }
  0xb0   :  { %v1039_v46 = vpop.eup %706  ;;  %718 = vpow2.f32 %v372_v23  ;;  %vm295_vm13 = vcmp.gt.f32.partialorder %v995_v56, 0.0 }
  0xb1   :  { %v378_v33 = vmul.f32 1.442695, %v326_v12  ;;  %v1049_v61 = vpop.eup %708 }
  0xb2   :  { %v1053_v8 = vpop.eup %710 }
  0xb3   :  { %v224_v42 = vpop.f32.mrf.mxu2  ;;  %v265_v43 = vpop.f32.mrf.mxu3  ;;  %720 = vpow2.f32 %v378_v33 }
  0xb4   :  { %v145_v51 = vpop.f32.mrf.mxu0  ;;  %v186_v59 = vpop.f32.mrf.mxu1  ;;  %v1017_v19 = vadd.f32 %v224_v42, %v918_v29  ;;  %v1023_v24 = vadd.f32 %v265_v43, %v918_v29  ;;  %v380_v42 = vmul.f32 1.442695, %v327_v16  ;;  %v1061_v16 = vadd.f32 %v957_v11, %v922_v37 }
  0xb5   :  { %v1000_v63 = vadd.f32 %v145_v51, %v924_v40  ;;  %v1006_v6 = vadd.f32 %v186_v59, %v924_v40  ;;  %v1043_v51 = vadd.f32 %v955_v10, %v922_v37  ;;  %v1057_v15 = vpop.eup %712 }
  0xb6   :  { %v328_v54 = vmin.f32 %v1017_v19, 0.0  ;;  %722 = vpow2.f32 %v380_v42 }
  0xb7   :  { %v330_v20 = vmin.f32 %v1000_v63, 0.0  ;;  %v331_v26 = vmin.f32 %v1006_v6, 0.0  ;;  %vm298_vm8 = vcmp.gt.f32.partialorder %v1000_v63, 0.0  ;;  %vm299_vm12 = vcmp.gt.f32.partialorder %v1006_v6, 0.0 }
  0xb9   :  { %v386_v57 = vmul.f32 1.442695, %v330_v20  ;;  %v388_v3 = vmul.f32 1.442695, %v331_v26  ;;  %v1064_v26 = vpop.eup %714 }
  0xba   :  { %v1066_v33 = vpop.eup %716 }
  0xbb   :  { %v227_v27 = vpop.f32.mrf.mxu2  ;;  %v268_v30 = vpop.f32.mrf.mxu3  ;;  %724 = vpow2.f32 %v386_v57 }
  0xbc   :  { %v1029_v35 = vadd.f32 %v227_v27, %v924_v40  ;;  %v148_v38 = vpop.f32.mrf.mxu0  ;;  %v1034_v45 = vadd.f32 %v268_v30, %v924_v40  ;;  %v189_v43 = vpop.f32.mrf.mxu1  ;;  %v329_v40 = vmin.f32 %v1023_v24, 0.0  ;;  %v382_v27 = vmul.f32 1.442695, %v328_v54 }
  0xbd   :  { %v1037_v29 = vadd.f32 %v148_v38, %v920_v34  ;;  %v1047_v59 = vadd.f32 %v189_v43, %v920_v34  ;;  %v324_v38 = vmin.f32 %v1043_v51, 0.0  ;;  %726 = vpow2.f32 %v388_v3  ;;  %v1075_v42 = vpop.eup %718 }
  0xbe   :  { %v332_v10 = vmin.f32 %v1029_v35, 0.0  ;;  %v333_v20 = vmin.f32 %v1034_v45, 0.0  ;;  %v384_v43 = vmul.f32 1.442695, %v329_v40  ;;  %v325_v54 = vmin.f32 %v1061_v16, 0.0 }
  0xbf   :  { %v334_v4 = vmin.f32 %v1037_v29, 0.0  ;;  %v335_v12 = vmin.f32 %v1047_v59, 0.0  ;;  %vm302_vm4 = vcmp.gt.f32.partialorder %v1037_v29, 0.0  ;;  %vm303_vm6 = vcmp.gt.f32.partialorder %v1047_v59, 0.0 }
  0xc0   :  { %v390_v0 = vmul.f32 1.442695, %v332_v10  ;;  %v392_v57 = vmul.f32 1.442695, %v333_v20  ;;  %v376_v62 = vmul.f32 1.442695, %v325_v54 }
  0xc1   :  { %v394_v23 = vmul.f32 1.442695, %v334_v4  ;;  %v396_v30 = vmul.f32 1.442695, %v335_v12  ;;  %v721_v4 = vpop.eup %720  ;;  %v374_v12 = vmul.f32 1.442695, %v324_v38 }
  0xc2   :  { %v723_v10 = vpop.eup %722 }
  0xc3   :  { %v230_v53 = vpop.f32.mrf.mxu2  ;;  %v271_v50 = vpop.f32.mrf.mxu3  ;;  %728 = vpow2.f32 %v394_v23 }
  0xc4   :  { %v1070_v37 = vadd.f32 %v230_v53, %v920_v34  ;;  %v1073_v11 = vadd.f32 %v271_v50, %v920_v34  ;;  %730 = vpow2.f32 %v396_v30  ;;  %v1081_v53 = vadd.f32 -1.0, %v979_v36  ;;  %v725_v50 = vpop.eup %724 }
  0xc5   :  { %732 = vpow2.f32 %v382_v27  ;;  %v1084_v34 = vadd.f32 -1.0, %v985_v44  ;;  %v727_v30 = vpop.eup %726  ;;  %v1087_v27 = vadd.f32 -1.0, %v1002_v1  ;;  %v1094_v36 = vadd.f32 -1.0, %v1020_v21 }
  0xc6   :  { %v336_v40 = vmin.f32 %v1070_v37, 0.0  ;;  %v337_v3 = vmin.f32 %v1073_v11, 0.0  ;;  %734 = vpow2.f32 %v384_v43  ;;  %v661_v54 = vadd.f32 -1.0, %v725_v50 }
  0xc7   :  { %736 = vpow2.f32 %v390_v0  ;;  %v1097_v0 = vadd.f32 -1.0, %v1026_v31  ;;  %vm304_vm15 = vcmp.gt.f32.partialorder %v1070_v37, 0.0 }
  0xc8   :  { %v398_v23 = vmul.f32 1.442695, %v336_v40  ;;  %v400_v20 = vmul.f32 1.442695, %v337_v3  ;;  %738 = vpow2.f32 %v392_v57  ;;  %v662_v57 = vadd.f32 -1.0, %v727_v30 }
  0xc9   :  { %v729_v43 = vpop.eup %728  ;;  %v657_v40 = vadd.f32 -1.0, %v721_v4  ;;  %v653_v4 = vadd.f32 -1.0, %v1066_v33 }
  0xca   :  { %740 = vpow2.f32 %v398_v23  ;;  %v731_v44 = vpop.eup %730  ;;  %v665_v38 = vadd.f32 -1.0, %v729_v43  ;;  %v459_v23 = vsel %vm299_vm12, %v1006_v6, %v662_v57  ;;  %vm284_vm12 = vcmp.gt.f32.partialorder %v953_v9, 0.0 }
  0xcb   :  { %742 = vpow2.f32 %v400_v20  ;;  %v733_v1 = vpop.eup %732  ;;  %v666_v7 = vadd.f32 -1.0, %v731_v44  ;;  %v649_v20 = vadd.f32 -1.0, %v1049_v61  ;;  %v650_v44 = vadd.f32 -1.0, %v1053_v8 }
  0xcc   :  { %744 = vpow2.f32 %v374_v12  ;;  %v735_v21 = vpop.eup %734  ;;  %v462_v31 = vsel %vm302_vm4, %v1037_v29, %v665_v38  ;;  %v658_v12 = vadd.f32 -1.0, %v723_v10  ;;  %v458_v29 = vsel %vm298_vm8, %v1000_v63, %v661_v54 }
  0xcd   :  { %746 = vpow2.f32 %v376_v62  ;;  %v737_v3 = vpop.eup %736  ;;  %495 = vmatpush.msrb.mxu0 %v462_v31  ;;  %v463_v50 = vsel %vm303_vm6, %v1047_v59, %v666_v7  ;;  %v654_v10 = vadd.f32 -1.0, %v1075_v42  ;;  %v454_v63 = vsel %vm294_vm9, %v989_v49, %v657_v40 }
  0xce   :  { %v739_v62 = vpop.eup %738  ;;  %518 = vmatpush.msrb.mxu1 %v463_v50  ;;  %v663_v33 = vadd.f32 -1.0, %v737_v3  ;;  %v455_v6 = vsel %vm295_vm13, %v995_v56, %v658_v12  ;;  %v450_v49 = vsel %vm290_vm2, %v976_v32, %v653_v4  ;;  %vm305_vm4 = vcmp.gt.f32.partialorder %v1073_v11, 0.0  ;;  %v473_v50 = vpop.permute.xlu2 %472 }
  0xcf   :  { %496 = vmatpush.msrb.mxu0 %v458_v29  ;;  %v664_v61 = vadd.f32 -1.0, %v739_v62  ;;  %v659_v7 = vadd.f32 -1.0, %v733_v1  ;;  %vm275_vm6 = vcmp.gt.f32.partialorder %v928_v48, 0.0  ;;  %v451_v56 = vsel %vm291_vm14, %v983_v41, %v654_v10 }
  0xd0   :  { %v741_v59 = vpop.eup %740  ;;  %519 = vmatpush.msrb.mxu1 %v459_v23  ;;  %vm300_vm8 = vcmp.gt.f32.partialorder %v1029_v35, 0.0  ;;  %v660_v31 = vadd.f32 -1.0, %v735_v21  ;;  %v446_v32 = vsel %vm286_vm1, %v963_v18, %v649_v20  ;;  %vm301_vm2 = vcmp.gt.f32.partialorder %v1034_v45, 0.0 }
  0xd1   :  { %v743_v30 = vpop.eup %742  ;;  %v667_v43 = vadd.f32 -1.0, %v741_v59  ;;  %497 = vmatpush.msrb.mxu0 %v454_v63  ;;  %v447_v41 = vsel %vm287_vm3, %v966_v22, %v650_v44  ;;  %vm296_vm9 = vcmp.gt.f32.partialorder %v1017_v19, 0.0  ;;  %v442_v18 = vsel %vm282_vm5, %v947_v2, %v1094_v36  ;;  %v1243_v36 = vld [vmem:[#allocation5_spill] sm:$0xff]  ;;  %v478_v59 = vpop.permute.xlu0 %477 }
  0xd2   :  { %v745_v38 = vpop.eup %744  ;;  %v668_v42 = vadd.f32 -1.0, %v743_v30  ;;  %520 = vmatpush.msrb.mxu1 %v455_v6  ;;  %vm297_vm1 = vcmp.gt.f32.partialorder %v1023_v24, 0.0  ;;  %v651_v40 = vadd.f32 -1.0, %v1057_v15  ;;  %v443_v22 = vsel %vm283_vm7, %v950_v5, %v1097_v0  ;;  %v467_v0 = vld [vmem:[%s1224_s3 + $0x8] sm:$0xff] }
  0xd3   :  { %v747_v54 = vpop.eup %746  ;;  %v464_v8 = vsel %vm304_vm15, %v1070_v37, %v667_v43  ;;  %498 = vmatpush.msrb.mxu0 %v450_v49  ;;  %v460_v37 = vsel %vm300_vm8, %v1029_v35, %v663_v33  ;;  %v655_v1 = vadd.f32 -1.0, %v745_v38  ;;  %v456_v35 = vsel %vm296_vm9, %v1017_v19, %v659_v7 }
  0xd4   :  { %541 = vmatpush.msrb.mxu2 %v464_v8  ;;  %v465_v57 = vsel %vm305_vm4, %v1073_v11, %v668_v42  ;;  %521 = vmatpush.msrb.mxu1 %v451_v56  ;;  %v461_v11 = vsel %vm301_vm2, %v1034_v45, %v664_v61  ;;  %v656_v21 = vadd.f32 -1.0, %v747_v54  ;;  %v457_v45 = vsel %vm297_vm1, %v1023_v24, %v660_v31 }
  0xd5   :  { %564 = vmatpush.msrb.mxu3 %v465_v57  ;;  %499 = vmatpush.msrb.mxu0 %v446_v32  ;;  %vm292_vm3 = vcmp.gt.f32.partialorder %v1043_v51, 0.0  ;;  %v652_v3 = vadd.f32 -1.0, %v1064_v26  ;;  %v438_v2 = vsel %vm278_vm10, %v934_v55, %v1087_v27  ;;  %v439_v19 = vsel %vm279_vm11, %v937_v58, %v1090_v60  ;;  %v466_v60 = vld [vmem:[%s1224_s3] sm:$0xff]  ;;  %s775_s3 = smov [#allocation2]  }
  0xd6   :  { %542 = vmatpush.msrb.mxu2 %v460_v37  ;;  %522 = vmatpush.msrb.mxu1 %v447_v41  ;;  %v452_v5 = vsel %vm292_vm3, %v1043_v51, %v655_v1  ;;  %vm293_vm5 = vcmp.gt.f32.partialorder %v1061_v16, 0.0  ;;  %vm288_vm7 = vcmp.gt.f32.partialorder %v969_v25, 0.0  ;;  %v647_v15 = vadd.f32 -1.0, %v1031_v39  ;;  %s591_s19 = sshll.u32 %s775_s3, 4  ;;  %s592_s19 = int_to_ptr.vmem [resolvable:$true] %s591_s19 }
  0xd7   :  { %565 = vmatpush.msrb.mxu3 %v461_v11  ;;  %500 = vmatpush.msrb.mxu0 %v442_v18  ;;  %v453_v24 = vsel %vm293_vm5, %v1061_v16, %v656_v21  ;;  %v648_v26 = vadd.f32 -1.0, %v1039_v46  ;;  %v434_v55 = vsel %vm274_vm0, %v926_v47, %v1081_v53  ;;  %v448_v58 = vsel %vm288_vm7, %v969_v25, %v651_v40  ;;  %v1240_v16 = vld [vmem:[#allocation9_spill] sm:$0xff]  ;;  %v1242_v53 = vld [vmem:[#allocation8_spill] sm:$0xff] }
  0xd8   :  { %543 = vmatpush.msrb.mxu2 %v456_v35  ;;  %523 = vmatpush.msrb.mxu1 %v443_v22  ;;  %vm289_vm10 = vcmp.gt.f32.partialorder %v972_v28, 0.0  ;;  %vm480_vm11 = vcmask 523264   ;;  %v435_v39 = vsel %vm275_vm6, %v928_v48, %v1084_v34  ;;  %v643_v47 = vadd.f32 -1.0, %v1011_v13 }
  0xd9   :  { %566 = vmatpush.msrb.mxu3 %v457_v45  ;;  %501 = vmatpush.msrb.mxu0 %v438_v2  ;;  %v449_v46 = vsel %vm289_vm10, %v972_v28, %v652_v3  ;;  %v644_v25 = vadd.f32 -1.0, %v1014_v17  ;;  %vm285_vm13 = vcmp.gt.f32.partialorder %v960_v14, 0.0  ;;  %v444_v51 = vsel %vm284_vm12, %v953_v9, %v647_v15  ;;  %v1241_v17 = vld [vmem:[#allocation7_spill] sm:$0xff]  ;;  %v1244_v9 = vld [vmem:[#allocation6_spill] sm:$0xff] }
  0xda   :  { %544 = vmatpush.msrb.mxu2 %v452_v5  ;;  %524 = vmatpush.msrb.mxu1 %v439_v19  ;;  %v445_v48 = vsel %vm285_vm13, %v960_v14, %v648_v26  ;;  %v639_v28 = vadd.f32 -1.0, %v991_v52  ;;  %v640_v13 = vadd.f32 -1.0, %v1240_v16  ;;  %vm280_vm14 = vcmp.gt.f32.partialorder %v1241_v17, 0.0 }
  0xdb   :  { %567 = vmatpush.msrb.mxu3 %v453_v24  ;;  %502 = vmatpush.msrb.mxu0 %v434_v55  ;;  %vm281_vm15 = vcmp.gt.f32.partialorder %v1242_v53, 0.0  ;;  %v440_v34 = vsel %vm280_vm14, %v1241_v17, %v643_v47  ;;  %vm276_vm0 = vcmp.gt.f32.partialorder %v1243_v36, 0.0  ;;  %vm277_vm4 = vcmp.gt.f32.partialorder %v1244_v9, 0.0 }
  0xdc   :  { %545 = vmatpush.msrb.mxu2 %v448_v58  ;;  %525 = vmatpush.msrb.mxu1 %v435_v39  ;;  %v441_v27 = vsel %vm281_vm15, %v1242_v53, %v644_v25  ;;  %v436_v14 = vsel %vm276_vm0, %v1243_v36, %v639_v28  ;;  %v437_v52 = vsel %vm277_vm4, %v1244_v9, %v640_v13 }
  0xdd   :  { %568 = vmatpush.msrb.mxu3 %v449_v46  ;;  %669 = vmatmul.msk.f32.vlgmr.msrb.gmra.mxu0 %vm480_vm11, %v466_v60 }
  0xde   :  { %671 = vmatmul.msk.f32.vlgmr.msrb.gmra.mxu1 %vm480_vm11, %v466_v60  ;;  %546 = vmatpush.msrb.mxu2 %v444_v51 }
  0xdf   :  { %569 = vmatpush.msrb.mxu3 %v445_v48 }
  0xe0   :  { %547 = vmatpush.msrb.mxu2 %v440_v34 }
  0xe1   :  { %570 = vmatpush.msrb.mxu3 %v441_v27 }
  0xe2   :  { %548 = vmatpush.msrb.mxu2 %v436_v14 }
  0xe3   :  { %571 = vmatpush.msrb.mxu3 %v437_v52  ;;  %673 = vmatmul.msk.f32.vlgmr.msrb.gmra.mxu2 %vm480_vm11, %v466_v60 }
  0xe4   :  { %675 = vmatmul.msk.f32.vlgmr.msrb.gmra.mxu3 %vm480_vm11, %v466_v60 }
  0xe5   :  { %670 = vmatmul.msk.f32.gmra.mxu0 %vm480_vm11, %v467_v0 }
  0xe6   :  { %672 = vmatmul.msk.f32.gmra.mxu1 %vm480_vm11, %v467_v0 }
  0xeb   :  { %674 = vmatmul.msk.f32.gmra.mxu2 %vm480_vm11, %v467_v0 }
  0xec   :  { %676 = vmatmul.msk.f32.gmra.mxu3 %vm480_vm11, %v467_v0 }
 0x15a   :  { %v504_v12 = vpop.f32.mrf.mxu0 }
 0x15b   :  { %v527_v62 = vpop.f32.mrf.mxu1  ;;  %v505_v29 = vadd.f32 %v504_v12, %v473_v50 }
 0x15c   :  { %v528_v4 = vadd.f32 %v527_v62, %v473_v50 }
 0x15d   :  { %579 = vst [vmem:[#allocation2] sm:$0xff] %v505_v29 }
 0x15e   :  { %580 = vst [vmem:[#allocation2 + $0x8] sm:$0xff] %v528_v4 }
 0x162   :  { %v507_v23 = vpop.f32.mrf.mxu0 }
 0x163   :  { %v530_v10 = vpop.f32.mrf.mxu1  ;;  %v508_v20 = vadd.f32 %v507_v23, %v478_v59 }
 0x164   :  { %v531_v30 = vadd.f32 %v530_v10, %v478_v59 }
 0x165   :  { %583 = vst [vmem:[#allocation2 + $0x20] sm:$0xff] %v508_v20 }
 0x166   :  { %584 = vst [vmem:[#allocation2 + $0x28] sm:$0xff] %v531_v30  ;;  %v550_v63 = vpop.f32.mrf.mxu2 }
 0x167   :  { %v573_v43 = vpop.f32.mrf.mxu3  ;;  %v551_v44 = vadd.f32 %v550_v63, %v473_v50 }
 0x168   :  { %v574_v33 = vadd.f32 %v573_v43, %v473_v50 }
 0x169   :  { %581 = vst [vmem:[#allocation2 + $0x10] sm:$0xff] %v551_v44 }
 0x16a   :  { %582 = vst [vmem:[#allocation2 + $0x18] sm:$0xff] %v574_v33 }
 0x16e   :  { %v553_v38 = vpop.f32.mrf.mxu2 }
 0x16f   :  { %v576_v6 = vpop.f32.mrf.mxu3  ;;  %v554_v42 = vadd.f32 %v553_v38, %v478_v59 }
 0x170   :  { %v577_v61 = vadd.f32 %v576_v6, %v478_v59 }
 0x171   :  { %585 = vst [vmem:[#allocation2 + $0x30] sm:$0xff] %v554_v42 }
 0x172   :  { %586 = vst [vmem:[#allocation2 + $0x38] sm:$0xff] %v577_v61 }
 0x173   :  { %599 = dma.vmem_to_hbm [thread:$0]  %s592_s19, 1024, %s594_s22, [#allocation3], %s776_s23, %s776_s23, %s777_s24  }
 0x174   :  { %772 = dma.done.wait [#allocation3], 1024  }
 0x175   :  { %773 = vsyncadd [#allocation3], 4294966272 }
 0x176   :  { %604 = vsyncpa [#allocation3], 1 }

</bundles_post_ra>
